<compile_context>
chip_gen: v5e
topology: v5e:2x2
jax: 0.10.0
libtpu: 0.0.40
codegen_flags: <defaults>
</compile_context>

<pallas_src>
import numpy as np
import jax
import jax.numpy as jnp
from jax.experimental import pallas as pl
from jax.experimental.pallas import tpu as pltpu


def agcn_kernel(x_ref, m_ref, b_ref, o_ref):
    # One MXU matmul per row tile: (r_tile, N*C) @ (N*C, N*dout) + bias.
    acc = jnp.dot(x_ref[...], m_ref[...], preferred_element_type=jnp.float32)
    o_ref[...] = (acc + b_ref[...]).astype(o_ref.dtype)


def _pick_row_tile(rows):
    """Largest convenient tile that divides the row count (keeps the (8,128) rule)."""
    for cand in (2048, 1024, 512, 256, 128, 64, 32, 16, 8):
        if rows % cand == 0:
            return cand
    return rows  # fall back to a single full-extent block


def agcn_forward(x, supports, weight, bias, cheb_k):
    """x: (B, N, T, C); supports: list of (N, N); weight: (dout, (2K+1)*C); bias: (dout,)."""
    B, N, T, C = x.shape
    dout = weight.shape[0]

    # ---- x-independent preprocessing (wrapper glue, tiny) -------------------
    # Chebyshev support set, exactly as the torch loop.
    eye = jnp.eye(N, dtype=jnp.float32)
    support_set = []
    for support in supports:
        ks = [eye, support]
        for _ in range(2, cheb_k):
            ks.append(2.0 * support @ ks[-1] - ks[-2])
        support_set.extend(ks)
    s_stack = jnp.stack([eye] + support_set, axis=0)           # (Kt, N, N); S_0 = I
    k_total = s_stack.shape[0]
    assert k_total == 2 * cheb_k + 1

    # nn.Linear: y = x_g @ W.T + b; concat chunk k of x_g hits rows [k*C:(k+1)*C] of W.T.
    w_k = weight.astype(jnp.float32).T.reshape(k_total, C, dout)   # (Kt, C, dout)

    # Fold propagation + MLP into one operator:
    #   out[b,m,t,d] = sum_{k,n,c} x[b,n,t,c] * S_k[n,m] * W_k[c,d] + bias[d]
    m2 = jnp.einsum('knm,kcd->ncmd', s_stack, w_k).reshape(N * C, N * dout)
    bias_row = jnp.tile(bias.astype(jnp.float32), N).reshape(1, N * dout)

    # x: (B, N, T, C) -> rows over (b, t), lane-dense columns (n, c).
    x2 = jnp.transpose(x, (0, 2, 1, 3)).reshape(B * T, N * C)

    # ---- Pallas kernel: single lane-dense matmul, tiled over B*T rows -------
    rows = B * T
    r_tile = _pick_row_tile(rows)
    grid = (rows // r_tile,)

    out2 = pl.pallas_call(
        agcn_kernel,
        out_shape=jax.ShapeDtypeStruct((rows, N * dout), x.dtype),
        grid_spec=pltpu.PrefetchScalarGridSpec(
            num_scalar_prefetch=0,
            grid=grid,
            in_specs=[
                pl.BlockSpec((r_tile, N * C), lambda i: (i, 0)),     # x row tile
                pl.BlockSpec((N * C, N * dout), lambda i: (0, 0)),   # fused operator (resident)
                pl.BlockSpec((1, N * dout), lambda i: (0, 0)),       # bias row (resident)
            ],
            out_specs=pl.BlockSpec((r_tile, N * dout), lambda i: (i, 0)),
        ),
        compiler_params=pltpu.CompilerParams(
            dimension_semantics=("parallel",),       # shard row tiles across TCs (v7x)
            vmem_limit_bytes=32 * 1024 * 1024,       # safe on v5e/v6e/v7x; usage is << this
        ),
    )(x2, m2, bias_row)

    # (B*T, N*dout) -> (B, N, T, dout)  (PyTorch output convention)
    return jnp.transpose(out2.reshape(B, T, N, dout), (0, 2, 1, 3))


def agcn_reference(x, supports, weight, bias, cheb_k):
    """Pure-JAX transcription of the PyTorch forward, for validation."""
    N = x.shape[1]
    x_g = [x]
    support_set = []
    for support in supports:
        ks = [jnp.eye(N, dtype=x.dtype), support]
        for _ in range(2, cheb_k):
            ks.append(2.0 * support @ ks[-1] - ks[-2])
        support_set.extend(ks)
    for s in support_set:
        x_g.append(jnp.einsum('bntc,nm->bmtc', x, s))
    x_g = jnp.concatenate(x_g, axis=-1)
    return x_g @ weight.T + bias


if __name__ == "__main__":
    B, N, T, C = 2, 16, 8, 4     # batch, nodes, time steps, dim_in
    cheb_k = 3
    dim_out = 8
    # (2 * cheb_k + 1) * dim_in input features to the MLP => exactly 2 supports.

    key = jax.random.PRNGKey(0)
    kx, ks1, ks2, kw, kb = jax.random.split(key, 5)

    x = jax.random.normal(kx, (B, N, T, C), dtype=jnp.float32)
    supports = [
        jax.nn.softmax(jax.random.normal(ks1, (N, N), dtype=jnp.float32), axis=-1),
        jax.nn.softmax(jax.random.normal(ks2, (N, N), dtype=jnp.float32), axis=-1),
    ]
    fan_in = (2 * cheb_k + 1) * C
    weight = jax.random.normal(kw, (dim_out, fan_in), dtype=jnp.float32) / np.sqrt(fan_in)
    bias = jax.random.normal(kb, (dim_out,), dtype=jnp.float32) * 0.01

    out = jax.block_until_ready(agcn_forward(x, supports, weight, bias, cheb_k))
    ref = jax.block_until_ready(agcn_reference(x, supports, weight, bias, cheb_k))

    assert out.shape == (B, N, T, dim_out), out.shape
    np.testing.assert_allclose(np.asarray(out), np.asarray(ref), rtol=1e-4, atol=1e-4)
    print("KERNEL_OK")
</pallas_src>

<mosaic_0001>
module attributes {stable_mosaic.version = 11 : i64} {
  func.func @agcn_kernel(%arg0: i32, %arg1: memref<16x64xf32, #tpu.memory_space<vmem>>, %arg2: memref<64x128xf32, #tpu.memory_space<vmem>>, %arg3: memref<1x128xf32, #tpu.memory_space<vmem>>, %arg4: memref<16x128xf32, #tpu.memory_space<vmem>>) attributes {dimension_semantics = [#tpu.dimension_semantics<parallel>], iteration_bounds = array<i64: 1>, scalar_prefetch = 0 : i64, scratch_operands = 0 : i64, tpu.core_type = #tpu.core_type<tc>, window_params = [{transform_indices = @transform_0, window_bounds = array<i64: 16, 64>}, {pipeline_mode = #tpu.pipeline_mode<synchronous>, transform_indices = @transform_1, window_bounds = array<i64: 64, 128>}, {pipeline_mode = #tpu.pipeline_mode<synchronous>, transform_indices = @transform_2, window_bounds = array<i64: 1, 128>}, {transform_indices = @transform_3, window_bounds = array<i64: 16, 128>}]} {
    %c0 = arith.constant 0 : index
    %c0_0 = arith.constant 0 : index
    %0 = vector.load %arg1[%c0, %c0_0] : memref<16x64xf32, #tpu.memory_space<vmem>>, vector<16x64xf32>
    %c0_1 = arith.constant 0 : index
    %c0_2 = arith.constant 0 : index
    %1 = vector.load %arg2[%c0_1, %c0_2] : memref<64x128xf32, #tpu.memory_space<vmem>>, vector<64x128xf32>
    %cst = arith.constant dense<0.000000e+00> : vector<16x128xf32>
    %2 = tpu.matmul %0, %1, %cst {dimension_numbers = #tpu.dot_dimension_numbers<[1], [0], [0], [1], [0, 0, 1, 1], [], []>} : vector<16x64xf32>, vector<64x128xf32>, vector<16x128xf32> -> vector<16x128xf32>
    %c0_3 = arith.constant 0 : index
    %c0_4 = arith.constant 0 : index
    %3 = vector.load %arg3[%c0_3, %c0_4] : memref<1x128xf32, #tpu.memory_space<vmem>>, vector<1x128xf32>
    %4 = vector.broadcast %3 : vector<1x128xf32> to vector<16x128xf32>
    %5 = arith.addf %2, %4 : vector<16x128xf32>
    %c0_5 = arith.constant 0 : index
    %c0_6 = arith.constant 0 : index
    %6 = vector.load %arg4[%c0_5, %c0_6] : memref<16x128xf32, #tpu.memory_space<vmem>>, vector<16x128xf32>
    tpu.vector_store %arg4[%c0_5, %c0_6], %5 {strides = array<i32>} : memref<16x128xf32, #tpu.memory_space<vmem>>, vector<16x128xf32>,
    return
  }
  func.func @transform_0(%arg0: i32) -> (i32, i32) {
    %c0_i32 = arith.constant 0 : i32
    %c0_i32_0 = arith.constant 0 : i32
    return %arg0, %c0_i32 : i32, i32
  }
  func.func @transform_1(%arg0: i32) -> (i32, i32) {
    %c0_i32 = arith.constant 0 : i32
    %c0_i32_0 = arith.constant 0 : i32
    %c0_i32_1 = arith.constant 0 : i32
    return %c0_i32, %c0_i32_0 : i32, i32
  }
  func.func @transform_2(%arg0: i32) -> (i32, i32) {
    %c0_i32 = arith.constant 0 : i32
    %c0_i32_0 = arith.constant 0 : i32
    %c0_i32_1 = arith.constant 0 : i32
    return %c0_i32, %c0_i32_0 : i32, i32
  }
  func.func @transform_3(%arg0: i32) -> (i32, i32) {
    %c0_i32 = arith.constant 0 : i32
    %c0_i32_0 = arith.constant 0 : i32
    return %arg0, %c0_i32 : i32, i32
  }
}

</mosaic_0001>

<bundles_post_ra>
// kernel: tpu_custom_call.1
= control target key start
LH: loop header
LB: loop body
LE: loop exit
PB: predicated region body
PF: predicated region fallthrough
CT: control target
= control target key end

     0   :  { %8 = vsyncpa [#allocation3], 0  ;;  %s253_s0 = inlined_call_operand.hbm [shape: f32[16,64], index: 0, kind: input, shape index: {}]   ;;  %s254_s1 = inlined_call_operand.hbm [shape: f32[64,128], index: 1, kind: input, shape index: {}]   ;;  %s255_s2 = inlined_call_operand.vmem [shape: f32[1,128], index: 2, kind: input, shape index: {}]   ;;  %s256_s3 = inlined_call_operand.hbm [shape: f32[16,128], index: 3, kind: output, shape index: {}]  }
   0x1   :  { %9 = vsyncpa [#allocation6], 0 }
   0x2   :  { %10 = vsyncpa [#allocation4], 0  ;;  %s15_s14 = sshll.u32 %s253_s0, 4  ;;  %s207_s15 = smov [#allocation2]   ;;  %s16_s14 = int_to_ptr.hbm [resolvable:$true] %s15_s14 }
   0x3   :  { %s17_s16 = sshll.u32 %s207_s15, 4  ;;  %s28_s19 = sshll.u32 %s254_s1, 4  ;;  %s18_s16 = int_to_ptr.vmem [resolvable:$true] %s17_s16  ;;  %s29_s19 = int_to_ptr.hbm [resolvable:$true] %s28_s19 }
   0x4   :  { %s208_s20 = smov 128   ;;  %s209_s21 = smov 8  }
   0x5   :  { %23 = dma.hbm_to_vmem [thread:$0]  %s16_s14, 256, %s18_s16, [#allocation3], %s208_s20, %s208_s20, %s209_s21  }
   0x6   :  { %s210_s22 = smov [#allocation5]  }
   0x7   :  { %s30_s23 = sshll.u32 %s210_s22, 4  ;;  %s31_s23 = int_to_ptr.vmem [resolvable:$true] %s30_s23 }
   0x8   :  { %36 = dma.hbm_to_vmem [thread:$0]  %s29_s19, 1024, %s31_s23, [#allocation6], %s208_s20, %s208_s20, %s209_s21  }
   0x9   :  { %201 = dma.done.wait [#allocation3], 256  }
   0xa   :  { %202 = vsyncadd [#allocation3], 4294967040 }
   0xb   :  { %203 = dma.done.wait [#allocation6], 1024  }
   0xc   :  { %204 = vsyncadd [#allocation6], 4294966272  ;;  %v56_v0 = vld [vmem:[#allocation5 + $0x38] sm:$0xff]  ;;  %v55_v1 = vld [vmem:[#allocation5 + $0x30] sm:$0xff]  ;;  %vm61_vm0 = vcmask 523264   ;;  %s211_s24 = smov [#allocation7]  }
   0xd   :  { %76 = vmatpush.msra.mxu0 %v56_v0  ;;  %115 = vmatpush.msra.mxu1 %v56_v0  ;;  %v54_v2 = vld [vmem:[#allocation5 + $0x28] sm:$0xff]  ;;  %v53_v3 = vld [vmem:[#allocation5 + $0x20] sm:$0xff]  ;;  %v52_v4 = vld [vmem:[#allocation5 + $0x18] sm:$0xff]  ;;  %s97_s25 = sshll.u32 %s211_s24, 4  ;;  %s99_s28 = sshll.u32 %s256_s3, 4  ;;  %s98_s25 = int_to_ptr.vmem [resolvable:$true] %s97_s25  ;;  %s100_s28 = int_to_ptr.hbm [resolvable:$true] %s99_s28 }
   0xe   :  { %v51_v5 = vld [vmem:[#allocation5 + $0x10] sm:$0xff]  ;;  %v50_v6 = vld [vmem:[#allocation5 + $0x8] sm:$0xff]  ;;  %v49_v7 = vld [vmem:[#allocation5] sm:$0xff] }
   0xf   :  { %77 = vmatpush.msra.mxu0 %v55_v1  ;;  %116 = vmatpush.msra.mxu1 %v55_v1  ;;  %v47_v8 = vld [vmem:[#allocation2] sm:$0xff]  ;;  %v48_v9 = vld [vmem:[#allocation2 + $0x8] sm:$0xff] }
  0x10   :  { %v128_v10 = vld [vmem:[%s255_s2] ss:$0 sm:$0xff] }
  0x11   :  { %78 = vmatpush.msra.mxu0 %v54_v2  ;;  %117 = vmatpush.msra.mxu1 %v54_v2 }
  0x13   :  { %79 = vmatpush.msra.mxu0 %v53_v3  ;;  %118 = vmatpush.msra.mxu1 %v53_v3 }
  0x15   :  { %80 = vmatpush.msra.mxu0 %v52_v4  ;;  %119 = vmatpush.msra.mxu1 %v52_v4 }
  0x17   :  { %81 = vmatpush.msra.mxu0 %v51_v5  ;;  %120 = vmatpush.msra.mxu1 %v51_v5 }
  0x19   :  { %82 = vmatpush.msra.mxu0 %v50_v6  ;;  %121 = vmatpush.msra.mxu1 %v50_v6 }
  0x1b   :  { %83 = vmatpush.msra.mxu0 %v49_v7  ;;  %122 = vmatpush.msra.mxu1 %v49_v7 }
  0x1c   :  { %113 = vmatmul.msk.f32.vlgmr.msra.gmra.mxu0 %vm61_vm0, %v47_v8  ;;  %114 = vmatmul.msk.f32.vlgmr.msra.gmra.mxu1 %vm61_vm0, %v48_v9 }
  0x99   :  { %v85_v11 = vpop.f32.mrf.mxu0  ;;  %v88_v12 = vpop.f32.mrf.mxu1 }
  0x9a   :  { %v86_v13 = vadd.f32 %v128_v10, %v85_v11  ;;  %v89_v14 = vadd.f32 %v128_v10, %v88_v12 }
  0x9c   :  { %91 = vst [vmem:[#allocation7] sm:$0xff] %v86_v13 }
  0x9d   :  { %92 = vst [vmem:[#allocation7 + $0x8] sm:$0xff] %v89_v14 }
  0x9e   :  { %105 = dma.vmem_to_hbm [thread:$0]  %s98_s25, 256, %s100_s28, [#allocation4], %s208_s20, %s208_s20, %s209_s21  }
  0x9f   :  { %205 = dma.done.wait [#allocation4], 256  }
  0xa0   :  { %206 = vsyncadd [#allocation4], 4294967040 }
  0xa1   :  { %110 = vsyncpa [#allocation3], 1 }
  0xa2   :  { %111 = vsyncpa [#allocation6], 1 }
  0xa3   :  { %112 = vsyncpa [#allocation4], 1 }

</bundles_post_ra>
